<compile_context>
chip_gen: v7x
topology: tpu7x:2x2x1
jax: 0.10.0
libtpu: 0.0.40
codegen_flags: <defaults>
</compile_context>

<pallas_src>
import jax
import jax.numpy as jnp
from jax.experimental import pallas as pl
from jax.experimental.pallas import tpu as pltpu

IN_FEATURES = 28 * 28        # 784
OUT_FEATURES = 10
OUT_PAD = 128                # lane-dense output width (zero-padded cols 10..127)
MAX_TB = 1024                # max batch tile; 2*TB*784*2B (x bufs) + out bufs << 32 MiB


def _round_up(n, m):
    return ((n + m - 1) // m) * m


def linear_kernel(x_ref, w_ref, o_ref):
    # (TB, 784) bf16 @ (784, 128) bf16 -> (TB, 128) f32 on the MXU.
    o_ref[...] = jnp.dot(
        x_ref[...], w_ref[...], preferred_element_type=jnp.float32
    )


def prepare_weight(w):
    """PyTorch-layout weight (10, 784) f32 -> (784, 128) bf16, lane-padded.

    Do this ONCE at init (outside the hot path): it fuses the transpose,
    dtype cast and zero-padding into a single persistent array.
    """
    w_t = jnp.asarray(w).T.astype(jnp.bfloat16)                      # (784, 10)
    return jnp.pad(w_t, ((0, 0), (0, OUT_PAD - OUT_FEATURES)))       # (784, 128)


def lr_forward(x, w_prepared):
    """x: (B, 784) f32, w_prepared: (784, 128) bf16  ->  (B, 10) f32."""
    B = x.shape[0]

    # Batch tile: multiple of 8 (sublane rule), capped so double-buffered x
    # tiles stay well inside the scoped-VMEM default on every generation
    # (TB=1024 bf16 -> ~3.2 MiB of x buffers, ~1 MiB of out buffers).
    TB = min(MAX_TB, _round_up(B, 8))
    B_pad = _round_up(B, TB)

    xb = x.astype(jnp.bfloat16)
    if B_pad != B:
        xb = jnp.pad(xb, ((0, B_pad - B), (0, 0)))

    grid = (B_pad // TB,)

    cost = pl.CostEstimate(
        flops=2 * B_pad * IN_FEATURES * OUT_PAD,
        transcendentals=0,
        bytes_accessed=(
            B_pad * IN_FEATURES * 2          # x (bf16)
            + IN_FEATURES * OUT_PAD * 2      # W (bf16, read once)
            + B_pad * OUT_PAD * 4            # out (f32)
        ),
    )

    out_padded = pl.pallas_call(
        linear_kernel,
        out_shape=jax.ShapeDtypeStruct((B_pad, OUT_PAD), jnp.float32),
        grid=grid,
        in_specs=[
            # x: streamed in batch tiles; last dim equals full array dim (784).
            pl.BlockSpec((TB, IN_FEATURES), lambda i: (i, 0)),
            # W: constant index_map -> DMA'd once, VMEM-resident across steps.
            pl.BlockSpec((IN_FEATURES, OUT_PAD), lambda i: (0, 0)),
        ],
        # Lane-dense (TB, 128) output block -> unmasked full-width stores.
        out_specs=pl.BlockSpec((TB, OUT_PAD), lambda i: (i, 0)),
        compiler_params=pltpu.CompilerParams(
            dimension_semantics=("parallel",),
        ),
        cost_estimate=cost,
    )(xb, w_prepared)

    return out_padded[:B, :OUT_FEATURES]


if __name__ == "__main__":
    key = jax.random.PRNGKey(0)
    k_x, k_w = jax.random.split(key)

    B = 8
    # Mimic nn.Linear's uniform(-1/sqrt(fan_in), +1/sqrt(fan_in)) init.
    bound = 1.0 / (IN_FEATURES ** 0.5)
    # PyTorch stores weight as (out, in) = (10, 784).
    w = jax.random.uniform(
        k_w, (OUT_FEATURES, IN_FEATURES), jnp.float32, minval=-bound, maxval=bound
    )
    x = jax.random.normal(k_x, (B, IN_FEATURES), jnp.float32)

    w_prepared = prepare_weight(w)          # one-time transpose + pad + bf16 cast
    out = lr_forward(x, w_prepared)
    out = jax.block_until_ready(out)

    # Reference 1: exact semantics of the module in f32 (loose tol for bf16 inputs).
    ref_f32 = x @ w.T
    # Reference 2: f32 matmul of the bf16-rounded operands (tight tol).
    ref_bf16 = x.astype(jnp.bfloat16).astype(jnp.float32) @ (
        w.astype(jnp.bfloat16).astype(jnp.float32).T
    )

    assert out.shape == (B, OUT_FEATURES)
    assert jnp.allclose(out, ref_bf16, atol=1e-3, rtol=1e-3)
    assert jnp.allclose(out, ref_f32, atol=3e-2, rtol=3e-2)

    print("KERNEL_OK")
</pallas_src>

<mosaic_0001>
module attributes {stable_mosaic.version = 11 : i64} {
  func.func @linear_kernel(%arg0: i32, %arg1: memref<8x784xbf16, #tpu.memory_space<vmem>>, %arg2: memref<784x128xbf16, #tpu.memory_space<vmem>>, %arg3: memref<8x128xf32, #tpu.memory_space<vmem>>) attributes {dimension_semantics = [#tpu.dimension_semantics<parallel>], iteration_bounds = array<i64: 1>, scalar_prefetch = 0 : i64, scratch_operands = 0 : i64, tpu.core_type = #tpu.core_type<tc>, window_params = [{transform_indices = @transform_0, window_bounds = array<i64: 8, 784>}, {pipeline_mode = #tpu.pipeline_mode<synchronous>, transform_indices = @transform_1, window_bounds = array<i64: 784, 128>}, {transform_indices = @transform_2, window_bounds = array<i64: 8, 128>}]} {
    %c0 = arith.constant 0 : index
    %c0_0 = arith.constant 0 : index
    %0 = vector.load %arg1[%c0, %c0_0] : memref<8x784xbf16, #tpu.memory_space<vmem>>, vector<8x784xbf16>
    %c0_1 = arith.constant 0 : index
    %c0_2 = arith.constant 0 : index
    %1 = vector.load %arg2[%c0_1, %c0_2] : memref<784x128xbf16, #tpu.memory_space<vmem>>, vector<784x128xbf16>
    %cst = arith.constant dense<0.000000e+00> : vector<8x128xf32>
    %2 = tpu.matmul %0, %1, %cst {dimension_numbers = #tpu.dot_dimension_numbers<[1], [0], [0], [1], [0, 0, 1, 1], [], []>} : vector<8x784xbf16>, vector<784x128xbf16>, vector<8x128xf32> -> vector<8x128xf32>
    %c0_3 = arith.constant 0 : index
    %c0_4 = arith.constant 0 : index
    %3 = vector.load %arg3[%c0_3, %c0_4] : memref<8x128xf32, #tpu.memory_space<vmem>>, vector<8x128xf32>
    tpu.vector_store %arg3[%c0_3, %c0_4], %2 {strides = array<i32>} : memref<8x128xf32, #tpu.memory_space<vmem>>, vector<8x128xf32>,
    return
  }
  func.func @transform_0(%arg0: i32) -> (i32, i32) {
    %c0_i32 = arith.constant 0 : i32
    %c0_i32_0 = arith.constant 0 : i32
    return %arg0, %c0_i32 : i32, i32
  }
  func.func @transform_1(%arg0: i32) -> (i32, i32) {
    %c0_i32 = arith.constant 0 : i32
    %c0_i32_0 = arith.constant 0 : i32
    %c0_i32_1 = arith.constant 0 : i32
    return %c0_i32, %c0_i32_0 : i32, i32
  }
  func.func @transform_2(%arg0: i32) -> (i32, i32) {
    %c0_i32 = arith.constant 0 : i32
    %c0_i32_0 = arith.constant 0 : i32
    return %arg0, %c0_i32 : i32, i32
  }
}

</mosaic_0001>

<bundles_post_ra>
// kernel: tpu_custom_call.1
= control target key start
LH: loop header
LB: loop body
LE: loop exit
PB: predicated region body
PF: predicated region fallthrough
CT: control target
= control target key end

     0   :  { %7 = vsyncpa [#allocation3], 0  ;;  %s971_s0 = inlined_call_operand.hbm [shape: bf16[8,784], index: 0, kind: input, shape index: {}]   ;;  %s972_s1 = inlined_call_operand.hbm [shape: bf16[784,128], index: 1, kind: input, shape index: {}]   ;;  %s973_s2 = inlined_call_operand.hbm [shape: f32[8,128], index: 2, kind: output, shape index: {}]  }
   0x1   :  { %8 = vsyncpa [#allocation6], 0 }
   0x2   :  { %9 = vsyncpa [#allocation4], 0  ;;  %s906_s9 = smov [#allocation2]   ;;  %s907_s11 = smov [#allocation5]  }
   0x3   :  { %s16_s10 = sshll.u32 %s906_s9, 4  ;;  %s25_s12 = sshll.u32 %s907_s11, 4  ;;  %s17_s10 = int_to_ptr.vmem [resolvable:$true] %s16_s10  ;;  %s928_s12 = int_to_ptr.vmem [resolvable:$true] %s25_s12 }
   0x4   :  { %s834_s15 = scalar_lea.hbm %s971_s0, 448 }
   0x5   :  { %p835_p0 = scmp.ne.s32.totalorder %s971_s0, %s834_s15  ;;  %p838_p1 = scmp.lt.u32.totalorder %s834_s15, %s971_s0 }
   0x7   :  { %p840_p2 = pnand %p838_p1, %p835_p0 }
   0x9   :  { %843 = shalt.err (!%p840_p2)
}
   0xa   :  { %s844_s20 = scalar_lea.vmem %s17_s10, 448  ;;  %p849_p4 = scmp.lt.s32.totalorder %s17_s10, %s17_s10 }
   0xb   :  { %p845_p3 = scmp.ne.s32.totalorder %s17_s10, %s844_s20  ;;  %p850_p5 = scmp.lt.s32.totalorder %s844_s20, %s844_s20 }
   0xd   :  { %p851_p6 = por %p850_p5, %p849_p4 }
   0xf   :  { %p852_p7 = pnand %p851_p6, %p845_p3 }
  0x11   :  { %855 = shalt.err (!%p852_p7)
}
  0x12   :  { %19 = dma.hbm_to_vmem [thread:$0]  %s971_s0, 448, %s17_s10, [#allocation3]  }
  0x13   :  { %s856_s25 = scalar_lea.hbm %s972_s1, 6272 }
  0x14   :  { %p857_p8 = scmp.ne.s32.totalorder %s972_s1, %s856_s25  ;;  %p860_p9 = scmp.lt.u32.totalorder %s856_s25, %s972_s1 }
  0x16   :  { %p862_p10 = pnand %p860_p9, %p857_p8 }
  0x18   :  { %865 = shalt.err (!%p862_p10)
}
  0x19   :  { %s866_s30 = scalar_lea.vmem %s928_s12, 6272  ;;  %p871_p12 = scmp.lt.s32.totalorder %s928_s12, %s928_s12 }
  0x1a   :  { %p867_p11 = scmp.ne.s32.totalorder %s928_s12, %s866_s30  ;;  %p872_p13 = scmp.lt.s32.totalorder %s866_s30, %s866_s30 }
  0x1c   :  { %p873_p0 = por %p872_p13, %p871_p12 }
  0x1e   :  { %p874_p1 = pnand %p873_p0, %p867_p11 }
  0x20   :  { %877 = shalt.err (!%p874_p1)
}
  0x21   :  { %s908_s0 = smov 64   ;;  %s909_s3 = smov 4  }
  0x22   :  { %31 = dma.hbm_to_vmem [thread:$0]  %s972_s1, 6272, %s928_s12, [#allocation6], %s908_s0, %s908_s0, %s909_s3  }
  0x23   :  { %900 = dma.done.wait [#allocation3], 448  }
  0x24   :  { %901 = vsyncadd [#allocation3], 4294966848 }
  0x25   :  { %902 = dma.done.wait [#allocation6], 6272  }
  0x26   :  { %903 = vsyncadd [#allocation6], 4294961024  ;;  %v778_v0 = vld [vmem:[#allocation5 + $0x40] sm:$0xff]   ;;  %v782_v4 = vld [vmem:[#allocation5 + $0x48] sm:$0xff]   ;;  %v910_v40 = vmov 0.0   ;;  %vm911_vm0 = vmmov 0  }
  0x27   :  { %v779_v1 = vld [vmem:[#allocation5 + $0xc0] sm:$0xff]   ;;  %697 = vmatprep.subr.bf16.mxu0 %v778_v0  ;;  %v783_v5 = vld [vmem:[#allocation5 + $0xc8] sm:$0xff]   ;;  %v786_v8 = vld [vmem:[#allocation5 + $0x50] sm:$0xff]   ;;  %vm459_vm1 = vcmask 130048   ;;  %s912_s1 = smov [#allocation7]  }
  0x28   :  { %v780_v2 = vld [vmem:[#allocation5] sm:$0xff]   ;;  %719 = vmatprep.subr.bf16.mxu1 %v779_v1  ;;  %v784_v6 = vld [vmem:[#allocation5 + $0x8] sm:$0xff]   ;;  %v787_v9 = vld [vmem:[#allocation5 + $0xd0] sm:$0xff]   ;;  %s630_s6 = sshll.u32 %s912_s1, 4  ;;  %s631_s6 = int_to_ptr.vmem [resolvable:$true] %s630_s6 }
  0x29   :  { %v781_v3 = vld [vmem:[#allocation5 + $0x80] sm:$0xff]   ;;  %698 = vmatpush3.bf16.msra.mxu0 %v780_v2  ;;  %v785_v7 = vld [vmem:[#allocation5 + $0x88] sm:$0xff]   ;;  %v788_v10 = vld [vmem:[#allocation5 + $0x10] sm:$0xff]   ;;  %s878_s7 = scalar_lea.vmem %s631_s6, 128  ;;  %p883_p3 = scmp.lt.s32.totalorder %s631_s6, %s631_s6 }
  0x2a   :  { %720 = vmatpush3.bf16.msra.mxu1 %v781_v3  ;;  %699 = vmatprep.subr.bf16.mxu0 %v782_v4  ;;  %v789_v11 = vld [vmem:[#allocation5 + $0x90] sm:$0xff]   ;;  %v790_v12 = vld [vmem:[#allocation5 + $0x58] sm:$0xff]   ;;  %v794_v16 = vld [vmem:[#allocation5 + $0x60] sm:$0xff]   ;;  %p879_p2 = scmp.ne.s32.totalorder %s631_s6, %s878_s7  ;;  %p884_p4 = scmp.lt.s32.totalorder %s878_s7, %s878_s7 }
  0x2b   :  { %721 = vmatprep.subr.bf16.mxu1 %v783_v5  ;;  %v791_v13 = vld [vmem:[#allocation5 + $0xd8] sm:$0xff]   ;;  %v795_v17 = vld [vmem:[#allocation5 + $0xe0] sm:$0xff]   ;;  %v798_v20 = vld [vmem:[#allocation5 + $0x68] sm:$0xff]  }
  0x2c   :  { %v792_v14 = vld [vmem:[#allocation5 + $0x18] sm:$0xff]   ;;  %v796_v18 = vld [vmem:[#allocation5 + $0x20] sm:$0xff]   ;;  %v799_v21 = vld [vmem:[#allocation5 + $0xe8] sm:$0xff]   ;;  %p885_p5 = por %p884_p4, %p883_p3 }
  0x2d   :  { %700 = vmatpush3.bf16.msra.mxu0 %v784_v6  ;;  %v793_v15 = vld [vmem:[#allocation5 + $0x98] sm:$0xff]   ;;  %v797_v19 = vld [vmem:[#allocation5 + $0xa0] sm:$0xff]   ;;  %v800_v22 = vld [vmem:[#allocation5 + $0x28] sm:$0xff]  }
  0x2e   :  { %722 = vmatpush3.bf16.msra.mxu1 %v785_v7  ;;  %701 = vmatprep.subr.bf16.mxu0 %v786_v8  ;;  %v801_v23 = vld [vmem:[#allocation5 + $0xa8] sm:$0xff]   ;;  %v802_v24 = vld [vmem:[#allocation5 + $0x70] sm:$0xff]   ;;  %v806_v28 = vld [vmem:[#allocation5 + $0x78] sm:$0xff]   ;;  %p886_p6 = pnand %p885_p5, %p879_p2 }
  0x2f   :  { %723 = vmatprep.subr.bf16.mxu1 %v787_v9  ;;  %v803_v25 = vld [vmem:[#allocation5 + $0xf0] sm:$0xff]   ;;  %v807_v29 = vld [vmem:[#allocation5 + $0xf8] sm:$0xff]   ;;  %v39_v32 = vld [vmem:[#allocation2] sm:$0xff] }
  0x30   :  { %v804_v26 = vld [vmem:[#allocation5 + $0x30] sm:$0xff]   ;;  %v808_v30 = vld [vmem:[#allocation5 + $0x38] sm:$0xff]   ;;  %v640_v34 = vcombine.low %v39_v32, %v39_v32  ;;  %v641_v35 = vcombine.high %v39_v32, %v39_v32  ;;  %v814_v38 = vld [vmem:[#allocation5 + $0x140] sm:$0xff]  }
  0x31   :  { %702 = vmatpush3.bf16.msra.mxu0 %v788_v10  ;;  %v805_v27 = vld [vmem:[#allocation5 + $0xb0] sm:$0xff]   ;;  %v809_v31 = vld [vmem:[#allocation5 + $0xb8] sm:$0xff]   ;;  %v815_v39 = vld [vmem:[#allocation5 + $0x100] sm:$0xff]  }
  0x32   :  { %724 = vmatpush3.bf16.msra.mxu1 %v789_v11  ;;  %703 = vmatprep.subr.bf16.mxu0 %v790_v12  ;;  %v40_v33 = vld [vmem:[#allocation2 + $0x8] sm:$0xff]  ;;  %v820_v45 = vld [vmem:[#allocation5 + $0x158] sm:$0xff]   ;;  %v822_v47 = vld [vmem:[#allocation5 + $0x160] sm:$0xff]  }
  0x33   :  { %725 = vmatprep.subr.bf16.mxu1 %v791_v13  ;;  %v642_v36 = vcombine.low %v40_v33, %v40_v33  ;;  %v643_v37 = vcombine.high %v40_v33, %v40_v33  ;;  %495 = vmatprep.mubr.bf16.mxu0 %v641_v35  ;;  %v816_v41 = vld [vmem:[#allocation5 + $0x148] sm:$0xff]   ;;  %v818_v43 = vld [vmem:[#allocation5 + $0x150] sm:$0xff]   ;;  %v821_v46 = vld [vmem:[#allocation5 + $0x118] sm:$0xff]  }
  0x34   :  { %v817_v42 = vld [vmem:[#allocation5 + $0x108] sm:$0xff]   ;;  %v819_v44 = vld [vmem:[#allocation5 + $0x110] sm:$0xff]   ;;  %v830_v48 = vld [vmem:[#allocation5 + $0x180] sm:$0xff]  }
  0x35   :  { %704 = vmatpush3.bf16.msra.mxu0 %v792_v14  ;;  %535 = vmatprep.mubr.bf16.mxu1 %v643_v37  ;;  %v41_v49 = vld [vmem:[#allocation2 + $0x10] sm:$0xff]  ;;  %v823_v50 = vld [vmem:[#allocation5 + $0x120] sm:$0xff]   ;;  %v833_v52 = vld [vmem:[#allocation2 + $0x18] ss:$0 sps:$4 sm:$0xff]  }
  0x36   :  { %726 = vmatpush3.bf16.msra.mxu1 %v793_v15  ;;  %705 = vmatprep.subr.bf16.mxu0 %v794_v16  ;;  %v645_v51 = vcombine.high %v41_v49, %v41_v49  ;;  %v824_v53 = vld [vmem:[#allocation5 + $0x168] sm:$0xff]   ;;  %v826_v55 = vld [vmem:[#allocation5 + $0x170] sm:$0xff]   ;;  %v828_v57 = vld [vmem:[#allocation5 + $0x178] sm:$0xff]   ;;  %v644_v59 = vcombine.low %v41_v49, %v41_v49 }
  0x37   :  { %727 = vmatprep.subr.bf16.mxu1 %v795_v17  ;;  %v825_v54 = vld [vmem:[#allocation5 + $0x128] sm:$0xff]   ;;  %v827_v56 = vld [vmem:[#allocation5 + $0x130] sm:$0xff]   ;;  %v829_v58 = vld [vmem:[#allocation5 + $0x138] sm:$0xff]  }
  0x39   :  { %706 = vmatpush3.bf16.msra.mxu0 %v796_v18 }
  0x3a   :  { %728 = vmatpush3.bf16.msra.mxu1 %v797_v19  ;;  %707 = vmatprep.subr.bf16.mxu0 %v798_v20 }
  0x3b   :  { %729 = vmatprep.subr.bf16.mxu1 %v799_v21 }
  0x3d   :  { %708 = vmatpush3.bf16.msra.mxu0 %v800_v22 }
  0x3e   :  { %730 = vmatpush3.bf16.msra.mxu1 %v801_v23  ;;  %709 = vmatprep.subr.bf16.mxu0 %v802_v24 }
  0x3f   :  { %731 = vmatprep.subr.bf16.mxu1 %v803_v25 }
  0x41   :  { %710 = vmatpush3.bf16.msra.mxu0 %v804_v26 }
  0x42   :  { %732 = vmatpush3.bf16.msra.mxu1 %v805_v27  ;;  %711 = vmatprep.subr.bf16.mxu0 %v806_v28 }
  0x43   :  { %733 = vmatprep.subr.bf16.mxu1 %v807_v29 }
  0x45   :  { %712 = vmatpush3.bf16.msra.mxu0 %v808_v30 }
  0x46   :  { %734 = vmatpush3.bf16.msra.mxu1 %v809_v31  ;;  %741 = vmatprep.subr.bf16.mxu0 %v814_v38 }
  0x47   :  { %765 = vmatprep.subr.bf16.mxu1 %v910_v40 }
  0x48   :  { %496 = vmatmul.mubr.bf16.vlgmr.msra.gmra.mrb[0].mxu0 %v640_v34 }
  0x49   :  { %536 = vmatmul.mubr.bf16.vlgmr.msra.gmra.mrb[0].mxu1 %v642_v36  ;;  %742 = vmatpush3.bf16.msra.mxu0 %v815_v39 }
  0x4a   :  { %767 = vmatprep.mubr.msk.bf16.mxu1 %vm911_vm0, %v910_v40  ;;  %743 = vmatprep.subr.bf16.mxu0 %v816_v41 }
  0x4b   :  { %766 = vmatpush3.bf16.msra.mxu1 %v830_v48  ;;  %575 = vmatprep.mubr.bf16.mxu0 %v645_v51 }
  0x4d   :  { %744 = vmatpush3.bf16.msra.mxu0 %v817_v42 }
  0x4e   :  { %745 = vmatprep.subr.bf16.mxu0 %v818_v43 }
  0x51   :  { %746 = vmatpush3.bf16.msra.mxu0 %v819_v44  ;;  %768 = vmatmul.mubr.msk.bf16.vlgmr.msra.gmra.mrb[4].mxu1 %vm459_vm1, %v833_v52 }
  0x52   :  { %747 = vmatprep.subr.bf16.mxu0 %v820_v45 }
  0x55   :  { %748 = vmatpush3.bf16.msra.mxu0 %v821_v46 }
  0x56   :  { %749 = vmatprep.subr.bf16.mxu0 %v822_v47 }
  0x59   :  { %750 = vmatpush3.bf16.msra.mxu0 %v823_v50 }
  0x5a   :  { %751 = vmatprep.subr.bf16.mxu0 %v824_v53 }
  0x5d   :  { %752 = vmatpush3.bf16.msra.mxu0 %v825_v54 }
  0x5e   :  { %753 = vmatprep.subr.bf16.mxu0 %v826_v55 }
  0x61   :  { %754 = vmatpush3.bf16.msra.mxu0 %v827_v56 }
  0x62   :  { %755 = vmatprep.subr.bf16.mxu0 %v828_v57 }
  0x65   :  { %756 = vmatpush3.bf16.msra.mxu0 %v829_v58 }
  0x68   :  { %576 = vmatmul.mubr.bf16.vlgmr.msra.gmra.mrb[4].mxu0 %v644_v59 }
 0x11b   :  { %v713_v60 = vpop.f32.mrb[0].mxu0 }
 0x11c   :  { %v735_v61 = vpop.f32.mrb[0].mxu1  ;;  %v714_v62 = vpop.f32.mrb[1].mxu0 }
 0x11d   :  { %v736_v63 = vpop.f32.mrb[1].mxu1  ;;  %v715_v0 = vadd.f32 %v714_v62, %v713_v60  ;;  %v716_v2 = vpop.f32.mrb[2].mxu0 }
 0x11e   :  { %v737_v1 = vadd.f32 %v736_v63, %v735_v61  ;;  %v738_v3 = vpop.f32.mrb[2].mxu1  ;;  %v717_v4 = vpop.f32.mrb[3].mxu0 }
 0x11f   :  { %v739_v5 = vpop.f32.mrb[3].mxu1 }
 0x120   :  { %v538_v6 = vadd.f32 %v737_v1, %v715_v0 }
 0x124   :  { %v617_v7 = vpop.f32.mrb[4].mxu1 }
 0x125   :  { %v769_v8 = vpop.f32.mrb[5].mxu1 }
 0x126   :  { %v620_v9 = vpop.f32.mrb[6].mxu1 }
 0x127   :  { %v770_v10 = vpop.f32.mrb[7].mxu1 }
 0x13b   :  { %v757_v11 = vpop.f32.mrb[4].mxu0 }
 0x13c   :  { %v758_v12 = vpop.f32.mrb[5].mxu0 }
 0x13d   :  { %v759_v13 = vadd.f32 %v758_v12, %v757_v11  ;;  %v760_v14 = vpop.f32.mrb[6].mxu0 }
 0x13e   :  { %v761_v15 = vpop.f32.mrb[7].mxu0 }
 0x13f   :  { %v578_v16 = vadd.f32 %v759_v13, %v538_v6 }
 0x141   :  { %v618_v17 = vadd.f32 %v617_v7, %v578_v16 }
 0x143   :  { %623 = vst [vmem:[#allocation7] sm:$0xff] %v618_v17 }
 0x144   :  { %889 = shalt.err (!%p886_p6)
}
 0x145   :  { %s890_s10 = scalar_lea.hbm %s973_s2, 128 }
 0x146   :  { %p891_p7 = scmp.ne.s32.totalorder %s973_s2, %s890_s10  ;;  %p894_p8 = scmp.lt.u32.totalorder %s890_s10, %s973_s2 }
 0x148   :  { %p896_p9 = pnand %p894_p8, %p891_p7 }
 0x14a   :  { %899 = shalt.err (!%p896_p9)
}
 0x14b   :  { %633 = dma.vmem_to_hbm [thread:$0]  %s631_s6, 128, %s973_s2, [#allocation4]  }
 0x14c   :  { %904 = dma.done.wait [#allocation4], 128  }
 0x14d   :  { %905 = vsyncadd [#allocation4], 4294967168 }
 0x14e   :  { %637 = vsyncpa [#allocation3], 1 }
 0x14f   :  { %638 = vsyncpa [#allocation6], 1 }
 0x150   :  { %639 = vsyncpa [#allocation4], 1 }

</bundles_post_ra>
